<compile_context>
chip_gen: v6e
topology: v6e:2x2x1
jax: 0.10.0
libtpu: 0.0.40
codegen_flags: <defaults>
</compile_context>

<pallas_src>
import functools

import jax
import jax.numpy as jnp
from jax import lax
from jax.experimental import pallas as pl
from jax.experimental.pallas import tpu as pltpu


def _round_up(n, m):
    return pl.cdiv(n, m) * m


def _bf16_act_supported():
    """bf16 VPU/EUP exists on v6e/v7x; v5e and older fall back to f32 acts."""
    try:
        kind = jax.devices()[0].device_kind.lower()
    except Exception:
        return False
    return not any(tag in kind for tag in ("v2", "v3", "v4", "v5"))


def _mlp_kernel(x_ref, w1_ref, b1_ref, w2_ref, b2_ref, w3_ref, b3_ref, o_ref,
                *, act_dtype):
    # x_ref: (TB, F_in) in the array's native layout.  Weights: (F_out, F_in),
    # biases: (F_out, 1).  All matmul results keep batch on the 128-lane axis
    # -> (F_out, TB), so bias adds, tanh, and output stores are lane-dense.
    x = x_ref[...].astype(w1_ref.dtype)          # cast to MXU dtype in-kernel

    # Layer 1: contract both operands on their last dim:
    # (hid, F_in) x (TB, F_in) -> (hid, TB).  Mosaic handles the rhs-side
    # transpose (XLU / MXU operand path), same pattern as q @ k^T in flash.
    dn = (((1,), (1,)), ((), ()))
    h = lax.dot_general(w1_ref[...], x, dn, preferred_element_type=jnp.float32)
    h = jnp.tanh((h + b1_ref[...]).astype(act_dtype))

    # Layer 2: Linear + tanh
    h = jnp.dot(w2_ref[...], h.astype(w2_ref.dtype),
                preferred_element_type=jnp.float32)          # (hid, TB)
    h = jnp.tanh((h + b2_ref[...]).astype(act_dtype))

    # Layer 3 (output head, zero-initialized in the reference module)
    o = jnp.dot(w3_ref[...], h.astype(w3_ref.dtype),
                preferred_element_type=jnp.float32)          # (F_out, TB)
    o_ref[...] = (o + b3_ref[...]).astype(o_ref.dtype)


@functools.partial(jax.jit, static_argnames=("tile_b", "use_bf16", "bf16_act"))
def _mlp_forward_impl(x, params, *, tile_b, use_bf16, bf16_act):
    B, f_in = x.shape
    hid = params["w1"].shape[0]
    f_out = params["w3"].shape[0]

    lane = 128
    b_lane = _round_up(B, lane)

    # Large lane-dense batch tile amortises the ~0.35us/grid-step overhead,
    # but keep >= 2 grid steps when the batch allows it so v7x megacore can
    # shard the "parallel" axis across its 2 TensorCores.
    tb = min(tile_b, b_lane)
    if b_lane >= 2 * lane:
        tb = min(tb, _round_up(pl.cdiv(b_lane, 2), lane))
    tb = max(lane, _round_up(tb, lane))
    b_pad = _round_up(B, tb)

    mxu_dtype = jnp.bfloat16 if use_bf16 else jnp.float32
    act_dtype = jnp.bfloat16 if (use_bf16 and bf16_act) else jnp.float32

    # x stays in native (B, F_in) layout.  Only when B isn't a tile multiple
    # do we emit a single fused pad(+cast) pass; otherwise x goes straight to
    # the kernel and the bf16 cast happens on the loaded tile (no extra HBM
    # pass over x).
    if b_pad != B:
        x_in = jnp.pad(x, ((0, b_pad - B), (0, 0))).astype(mxu_dtype)
    else:
        x_in = x

    w1 = params["w1"].astype(mxu_dtype)
    w2 = params["w2"].astype(mxu_dtype)
    w3 = params["w3"].astype(mxu_dtype)
    b1 = params["b1"].astype(jnp.float32)        # bias add in f32 accumulator
    b2 = params["b2"].astype(jnp.float32)
    b3 = params["b3"].astype(jnp.float32)

    grid = (b_pad // tb,)
    full = lambda i: (0, 0)   # weights/biases: grid-invariant full blocks

    cost = pl.CostEstimate(
        flops=2 * b_pad * (f_in * hid + hid * hid + hid * f_out),
        transcendentals=2 * b_pad * hid,
        bytes_accessed=(x_in.size * x_in.dtype.itemsize
                        + (w1.size + w2.size + w3.size) * w1.dtype.itemsize
                        + (b1.size + b2.size + b3.size) * 4
                        + f_out * b_pad * 4),
    )

    out_t = pl.pallas_call(
        functools.partial(_mlp_kernel, act_dtype=act_dtype),
        out_shape=jax.ShapeDtypeStruct((f_out, b_pad), jnp.float32),
        grid=grid,
        in_specs=[
            pl.BlockSpec((tb, f_in), lambda i: (i, 0)),   # x tile, native layout
            pl.BlockSpec((hid, f_in), full),              # w1
            pl.BlockSpec((hid, 1), full),                 # b1
            pl.BlockSpec((hid, hid), full),               # w2
            pl.BlockSpec((hid, 1), full),                 # b2
            pl.BlockSpec((f_out, hid), full),             # w3
            pl.BlockSpec((f_out, 1), full),               # b3
        ],
        out_specs=pl.BlockSpec((f_out, tb), lambda i: (0, i)),
        compiler_params=pltpu.CompilerParams(
            dimension_semantics=("parallel",),
        ),
        cost_estimate=cost,
    )(x_in, w1, b1, w2, b2, w3, b3)

    return out_t[:, :B].T                         # back to (B, F_out)


def mlp_forward(x, params, *, tile_b=8192, use_bf16=True):
    """x: (B, F_in) float32. params: w* as (out, in), b* as (out, 1), float32.

    Returns (B, F_out) float32.  use_bf16=False is the full-f32 escape hatch
    (e.g. when this MLP feeds a CNF/ODE integrator and error compounds).
    """
    return _mlp_forward_impl(x, params, tile_b=tile_b, use_bf16=use_bf16,
                             bf16_act=_bf16_act_supported())


def init_params(key, input_size, hidden_size, output_size, init_zeros=True):
    """Weights stored (out, in) like torch.nn.Linear.weight; biases (out, 1)."""
    k1, k2, k3, k4, k5, k6 = jax.random.split(key, 6)

    def lin_init(kw, kb, fan_in, fan_out):
        bound = 1.0 / jnp.sqrt(fan_in)
        w = jax.random.uniform(kw, (fan_out, fan_in), jnp.float32, -bound, bound)
        b = jax.random.uniform(kb, (fan_out, 1), jnp.float32, -bound, bound)
        return w, b

    w1, b1 = lin_init(k1, k2, input_size, hidden_size)
    w2, b2 = lin_init(k3, k4, hidden_size, hidden_size)
    if init_zeros:
        w3 = jnp.zeros((output_size, hidden_size), jnp.float32)
        b3 = jnp.zeros((output_size, 1), jnp.float32)
    else:
        w3, b3 = lin_init(k5, k6, hidden_size, output_size)
    return {"w1": w1, "b1": b1, "w2": w2, "b2": b2, "w3": w3, "b3": b3}


def mlp_reference(x, p):
    """Pure-JAX f32 reference of the same forward."""
    h = jnp.tanh(x @ p["w1"].T + p["b1"][:, 0])
    h = jnp.tanh(h @ p["w2"].T + p["b2"][:, 0])
    return h @ p["w3"].T + p["b3"][:, 0]


if __name__ == "__main__":
    # Module config: two 16-d inputs concatenated -> input_size=32, hidden=32,
    # output=8, n_layers=3, activation=Tanh, add_layer_norm=False.
    B, F1, F2, HID, OUT = 8, 16, 16, 32, 8

    key = jax.random.PRNGKey(0)
    kx1, kx2, kp = jax.random.split(key, 3)
    x1 = jax.random.normal(kx1, (B, F1), jnp.float32)
    x2 = jax.random.normal(kx2, (B, F2), jnp.float32)

    # forward(*x): concatenate non-None inputs along the last dim (glue, JAX).
    mlp_input = jnp.concatenate([x1, x2], axis=-1)        # (B, 32)

    # --- Check 1: module default config (init_zeros=True), bf16 MXU path ---
    params = init_params(kp, F1 + F2, HID, OUT, init_zeros=True)
    out = jax.block_until_ready(mlp_forward(mlp_input, params))
    ref = mlp_reference(mlp_input, params)
    assert out.shape == (B, OUT)
    assert jnp.allclose(out, ref, atol=2e-2, rtol=2e-2)

    # --- Check 2: non-trivial head (init_zeros=False), pure f32, tight tol ---
    params_nz = init_params(kp, F1 + F2, HID, OUT, init_zeros=False)
    out_f32 = jax.block_until_ready(
        mlp_forward(mlp_input, params_nz, use_bf16=False))
    ref_nz = mlp_reference(mlp_input, params_nz)
    assert jnp.allclose(out_f32, ref_nz, atol=1e-5, rtol=1e-5)

    # --- Check 3: multi-tile grid + batch padding (B not a tile multiple) ---
    Bw = 300
    xw = jax.random.normal(jax.random.PRNGKey(1), (Bw, F1 + F2), jnp.float32)
    out_w = jax.block_until_ready(
        mlp_forward(xw, params_nz, tile_b=128, use_bf16=True))
    ref_w = mlp_reference(xw, params_nz)
    assert out_w.shape == (Bw, OUT)
    assert jnp.allclose(out_w, ref_w, atol=2e-2, rtol=2e-2)

    # --- Check 4: no-pad fast path (B a tile multiple, >=2 grid steps,
    #              in-kernel bf16 cast of the native f32 x) ---
    Bn = 256
    xn = jax.random.normal(jax.random.PRNGKey(2), (Bn, F1 + F2), jnp.float32)
    out_n = jax.block_until_ready(mlp_forward(xn, params_nz))
    ref_n = mlp_reference(xn, params_nz)
    assert out_n.shape == (Bn, OUT)
    assert jnp.allclose(out_n, ref_n, atol=2e-2, rtol=2e-2)

    print("KERNEL_OK")
</pallas_src>

<mosaic_0001>
module attributes {stable_mosaic.version = 11 : i64} {
  func.func @_mlp_kernel(%arg0: i32, %arg1: memref<128x32xbf16, #tpu.memory_space<vmem>>, %arg2: memref<32x32xbf16, #tpu.memory_space<vmem>>, %arg3: memref<32x1xf32, #tpu.memory_space<vmem>>, %arg4: memref<32x32xbf16, #tpu.memory_space<vmem>>, %arg5: memref<32x1xf32, #tpu.memory_space<vmem>>, %arg6: memref<8x32xbf16, #tpu.memory_space<vmem>>, %arg7: memref<8x1xf32, #tpu.memory_space<vmem>>, %arg8: memref<8x128xf32, #tpu.memory_space<vmem>>) attributes {dimension_semantics = [#tpu.dimension_semantics<parallel>], iteration_bounds = array<i64: 1>, scalar_prefetch = 0 : i64, scratch_operands = 0 : i64, tpu.core_type = #tpu.core_type<tc>, window_params = [{transform_indices = @transform_0, window_bounds = array<i64: 128, 32>}, {pipeline_mode = #tpu.pipeline_mode<synchronous>, transform_indices = @transform_1, window_bounds = array<i64: 32, 32>}, {pipeline_mode = #tpu.pipeline_mode<synchronous>, transform_indices = @transform_2, window_bounds = array<i64: 32, 1>}, {pipeline_mode = #tpu.pipeline_mode<synchronous>, transform_indices = @transform_3, window_bounds = array<i64: 32, 32>}, {pipeline_mode = #tpu.pipeline_mode<synchronous>, transform_indices = @transform_4, window_bounds = array<i64: 32, 1>}, {pipeline_mode = #tpu.pipeline_mode<synchronous>, transform_indices = @transform_5, window_bounds = array<i64: 8, 32>}, {pipeline_mode = #tpu.pipeline_mode<synchronous>, transform_indices = @transform_6, window_bounds = array<i64: 8, 1>}, {transform_indices = @transform_7, window_bounds = array<i64: 8, 128>}]} {
    %c0 = arith.constant 0 : index
    %c0_0 = arith.constant 0 : index
    %0 = vector.load %arg1[%c0, %c0_0] : memref<128x32xbf16, #tpu.memory_space<vmem>>, vector<128x32xbf16>
    %c0_1 = arith.constant 0 : index
    %c0_2 = arith.constant 0 : index
    %1 = vector.load %arg2[%c0_1, %c0_2] : memref<32x32xbf16, #tpu.memory_space<vmem>>, vector<32x32xbf16>
    %cst = arith.constant dense<0.000000e+00> : vector<32x128xf32>
    %2 = tpu.matmul %1, %0, %cst {dimension_numbers = #tpu.dot_dimension_numbers<[1], [1], [0], [0], [0, 0, 1, 0], [], []>} : vector<32x32xbf16>, vector<128x32xbf16>, vector<32x128xf32> -> vector<32x128xf32>
    %c0_3 = arith.constant 0 : index
    %c0_4 = arith.constant 0 : index
    %3 = vector.load %arg3[%c0_3, %c0_4] : memref<32x1xf32, #tpu.memory_space<vmem>>, vector<32x1xf32>
    %4 = vector.broadcast %3 : vector<32x1xf32> to vector<32x128xf32>
    %5 = arith.addf %2, %4 : vector<32x128xf32>
    %6 = arith.truncf %5 : vector<32x128xf32> to vector<32x128xbf16>
    %7 = math.tanh %6 : vector<32x128xbf16>
    %c0_5 = arith.constant 0 : index
    %c0_6 = arith.constant 0 : index
    %8 = vector.load %arg4[%c0_5, %c0_6] : memref<32x32xbf16, #tpu.memory_space<vmem>>, vector<32x32xbf16>
    %cst_7 = arith.constant dense<0.000000e+00> : vector<32x128xf32>
    %9 = tpu.matmul %8, %7, %cst_7 {dimension_numbers = #tpu.dot_dimension_numbers<[1], [0], [0], [1], [0, 0, 1, 1], [], []>} : vector<32x32xbf16>, vector<32x128xbf16>, vector<32x128xf32> -> vector<32x128xf32>
    %c0_8 = arith.constant 0 : index
    %c0_9 = arith.constant 0 : index
    %10 = vector.load %arg5[%c0_8, %c0_9] : memref<32x1xf32, #tpu.memory_space<vmem>>, vector<32x1xf32>
    %11 = vector.broadcast %10 : vector<32x1xf32> to vector<32x128xf32>
    %12 = arith.addf %9, %11 : vector<32x128xf32>
    %13 = arith.truncf %12 : vector<32x128xf32> to vector<32x128xbf16>
    %14 = math.tanh %13 : vector<32x128xbf16>
    %c0_10 = arith.constant 0 : index
    %c0_11 = arith.constant 0 : index
    %15 = vector.load %arg6[%c0_10, %c0_11] : memref<8x32xbf16, #tpu.memory_space<vmem>>, vector<8x32xbf16>
    %cst_12 = arith.constant dense<0.000000e+00> : vector<8x128xf32>
    %16 = tpu.matmul %15, %14, %cst_12 {dimension_numbers = #tpu.dot_dimension_numbers<[1], [0], [0], [1], [0, 0, 1, 1], [], []>} : vector<8x32xbf16>, vector<32x128xbf16>, vector<8x128xf32> -> vector<8x128xf32>
    %c0_13 = arith.constant 0 : index
    %c0_14 = arith.constant 0 : index
    %17 = vector.load %arg7[%c0_13, %c0_14] : memref<8x1xf32, #tpu.memory_space<vmem>>, vector<8x1xf32>
    %18 = vector.broadcast %17 : vector<8x1xf32> to vector<8x128xf32>
    %19 = arith.addf %16, %18 : vector<8x128xf32>
    %c0_15 = arith.constant 0 : index
    %c0_16 = arith.constant 0 : index
    %20 = vector.load %arg8[%c0_15, %c0_16] : memref<8x128xf32, #tpu.memory_space<vmem>>, vector<8x128xf32>
    tpu.vector_store %arg8[%c0_15, %c0_16], %19 {strides = array<i32>} : memref<8x128xf32, #tpu.memory_space<vmem>>, vector<8x128xf32>,
    return
  }
  func.func @transform_0(%arg0: i32) -> (i32, i32) {
    %c0_i32 = arith.constant 0 : i32
    %c0_i32_0 = arith.constant 0 : i32
    return %arg0, %c0_i32 : i32, i32
  }
  func.func @transform_1(%arg0: i32) -> (i32, i32) {
    %c0_i32 = arith.constant 0 : i32
    %c0_i32_0 = arith.constant 0 : i32
    %c0_i32_1 = arith.constant 0 : i32
    return %c0_i32, %c0_i32_0 : i32, i32
  }
  func.func @transform_2(%arg0: i32) -> (i32, i32) {
    %c0_i32 = arith.constant 0 : i32
    %c0_i32_0 = arith.constant 0 : i32
    %c0_i32_1 = arith.constant 0 : i32
    return %c0_i32, %c0_i32_0 : i32, i32
  }
  func.func @transform_3(%arg0: i32) -> (i32, i32) {
    %c0_i32 = arith.constant 0 : i32
    %c0_i32_0 = arith.constant 0 : i32
    %c0_i32_1 = arith.constant 0 : i32
    return %c0_i32, %c0_i32_0 : i32, i32
  }
  func.func @transform_4(%arg0: i32) -> (i32, i32) {
    %c0_i32 = arith.constant 0 : i32
    %c0_i32_0 = arith.constant 0 : i32
    %c0_i32_1 = arith.constant 0 : i32
    return %c0_i32, %c0_i32_0 : i32, i32
  }
  func.func @transform_5(%arg0: i32) -> (i32, i32) {
    %c0_i32 = arith.constant 0 : i32
    %c0_i32_0 = arith.constant 0 : i32
    %c0_i32_1 = arith.constant 0 : i32
    return %c0_i32, %c0_i32_0 : i32, i32
  }
  func.func @transform_6(%arg0: i32) -> (i32, i32) {
    %c0_i32 = arith.constant 0 : i32
    %c0_i32_0 = arith.constant 0 : i32
    %c0_i32_1 = arith.constant 0 : i32
    return %c0_i32, %c0_i32_0 : i32, i32
  }
  func.func @transform_7(%arg0: i32) -> (i32, i32) {
    %c0_i32 = arith.constant 0 : i32
    %c0_i32_0 = arith.constant 0 : i32
    return %c0_i32, %arg0 : i32, i32
  }
}

</mosaic_0001>

<bundles_post_ra>
// kernel: _mlp_forward_impl.1
= control target key start
LH: loop header
LB: loop body
LE: loop exit
PB: predicated region body
PF: predicated region fallthrough
CT: control target
= control target key end

     0   :  { %vm121_vm0 = vcmask 261120   ;;  %v460_v1 = vmov 0   ;;  %v461_v46 = vmov 0.0   ;;  %vm462_vm1 = vmmov 0   ;;  %s593_s0 = inlined_call_operand.vmem [shape: bf16[128,32], index: 0, kind: input, shape index: {}]   ;;  %s594_s1 = inlined_call_operand.vmem [shape: bf16[32,32], index: 1, kind: input, shape index: {}]   ;;  %s595_s2 = inlined_call_operand.vmem [shape: f32[32,1], index: 2, kind: input, shape index: {}]   ;;  %s596_s4 = inlined_call_operand.vmem [shape: f32[32,1], index: 4, kind: input, shape index: {}]   ;;  %s597_s6 = inlined_call_operand.vmem [shape: f32[8,1], index: 6, kind: input, shape index: {}]   ;;  %s598_s3 = inlined_call_operand.vmem [shape: bf16[32,32], index: 3, kind: input, shape index: {}]   ;;  %s599_s5 = inlined_call_operand.vmem [shape: bf16[8,32], index: 5, kind: input, shape index: {}]   ;;  %s600_s7 = inlined_call_operand.vmem [shape: f32[8,128], index: 7, kind: output, shape index: {}]  }
   0x1   :  { %v440_v0 = vld [vmem:[%s593_s0 + $0x38] sm:$0xff]   ;;  %438 = vset.pattern.permute.xlu0 %v460_v1  ;;  %439 = vset.pattern.permute.xlu1 %v460_v1  ;;  %v441_v2 = vld [vmem:[%s593_s0 + $0x30] sm:$0xff]   ;;  %v442_v4 = vld [vmem:[%s593_s0 + $0x28] sm:$0xff]  }
   0x2   :  { %427 = vmatprep.subr.msk.bf16.mxu0 %vm121_vm0, %v440_v0  ;;  %v150_v3 = vsel %vm121_vm0, %v440_v0, 0  ;;  %v147_v5 = vsel %vm121_vm0, %v441_v2, 0  ;;  %v448_v6 = vld [vmem:[%s594_s1] sm:$0xff]   ;;  %v49_v7 = vld [vmem:[%s595_s2 + $0x10] sm:$0xff]  ;;  %v50_v9 = vld [vmem:[%s595_s2 + $0x18] sm:$0xff]  ;;  %v144_v11 = vsel %vm121_vm0, %v442_v4, 0 }
   0x3   :  { %392 = vmatpush3.bf16.xpose.msra.mxu0 %v150_v3  ;;  %407 = vmatprep.mubr.msk.bf16.mxu0 %vm121_vm0, %v448_v6  ;;  %v47_v8 = vld [vmem:[%s595_s2] sm:$0xff]  ;;  %v48_v10 = vld [vmem:[%s595_s2 + $0x8] sm:$0xff]  ;;  %v211_v13 = vld [vmem:[%s596_s4 + $0x10] sm:$0xff] }
   0x4   :  { %428 = vmatprep.subr.msk.bf16.mxu0 %vm121_vm0, %v441_v2  ;;  %63 = vperm.xlu0 %438, %v49_v7   ;;  %v443_v12 = vld [vmem:[%s593_s0 + $0x20] sm:$0xff]   ;;  %v212_v14 = vld [vmem:[%s596_s4 + $0x18] sm:$0xff]  ;;  %v210_v16 = vld [vmem:[%s596_s4 + $0x8] sm:$0xff] }
   0x5   :  { %53 = vperm.xlu1 %439, %v47_v8   ;;  %v209_v15 = vld [vmem:[%s596_s4] sm:$0xff]  ;;  %v141_v17 = vsel %vm121_vm0, %v443_v12, 0  ;;  %v444_v18 = vld [vmem:[%s593_s0 + $0x18] sm:$0xff]   ;;  %v445_v21 = vld [vmem:[%s593_s0 + $0x10] sm:$0xff]  }
   0x6   :  { %v303_v19 = vld [vmem:[%s597_s6] sm:$0xff]  ;;  %v138_v20 = vsel %vm121_vm0, %v444_v18, 0  ;;  %v135_v22 = vsel %vm121_vm0, %v445_v21, 0  ;;  %v446_v23 = vld [vmem:[%s593_s0 + $0x8] sm:$0xff]  }
   0x7   :  { %v132_v24 = vsel %vm121_vm0, %v446_v23, 0  ;;  %v447_v25 = vld [vmem:[%s593_s0] sm:$0xff]   ;;  %v449_v27 = vld [vmem:[%s594_s1 + $0x8] sm:$0xff]  }
   0x8   :  { %68 = vperm.xlu0 %438, %v50_v9   ;;  %v129_v26 = vsel %vm121_vm0, %v447_v25, 0  ;;  %v450_v28 = vld [vmem:[%s598_s3] sm:$0xff]   ;;  %v451_v45 = vld [vmem:[%s598_s3 + $0x8] sm:$0xff]  }
   0x9   :  { %58 = vperm.xlu1 %439, %v48_v10   ;;  %415 = vmatprep.mubr.msk.bf16.mxu1 %vm121_vm0, %v450_v28  ;;  %v302_v63 = vld [vmem:[%s599_s5] sm:$0xf] }
   0xb   :  { %394 = vmatpush3.bf16.xpose.msra.mxu0 %v147_v5 }
   0xc   :  { %429 = vmatprep.subr.msk.bf16.mxu0 %vm121_vm0, %v442_v4  ;;  %225 = vperm.xlu0 %438, %v211_v13  }
   0xd   :  { %230 = vperm.xlu1 %439, %v212_v14  }
  0x10   :  { %215 = vperm.xlu0 %438, %v209_v15  }
  0x11   :  { %220 = vperm.xlu1 %439, %v210_v16  }
  0x13   :  { %396 = vmatpush3.bf16.xpose.msra.mxu0 %v144_v11 }
  0x14   :  { %430 = vmatprep.subr.msk.bf16.mxu0 %vm121_vm0, %v443_v12  ;;  %306 = vperm.xlu0 %438, %v303_v19  }
  0x1b   :  { %398 = vmatpush3.bf16.xpose.msra.mxu0 %v141_v17 }
  0x1c   :  { %431 = vmatprep.subr.msk.bf16.mxu0 %vm121_vm0, %v444_v18 }
  0x23   :  { %400 = vmatpush3.bf16.xpose.msra.mxu0 %v138_v20 }
  0x24   :  { %432 = vmatprep.subr.msk.bf16.mxu0 %vm121_vm0, %v445_v21 }
  0x2b   :  { %402 = vmatpush3.bf16.xpose.msra.mxu0 %v135_v22 }
  0x2c   :  { %433 = vmatprep.subr.msk.bf16.mxu0 %vm121_vm0, %v446_v23 }
  0x33   :  { %404 = vmatpush3.bf16.xpose.msra.mxu0 %v132_v24 }
  0x34   :  { %434 = vmatprep.subr.msk.bf16.mxu0 %vm121_vm0, %v447_v25 }
  0x3b   :  { %406 = vmatpush3.bf16.xpose.msra.mxu0 %v129_v26 }
  0x42   :  { %408 = vmatmul.mubr.msk.bf16.vlgmr.msra.gmra.mxu0 %vm121_vm0, %v449_v27 }
  0x7f   :  { %v64_v29 = vpop.permute.xlu0 %63 }
  0x80   :  { %v54_v30 = vpop.permute.xlu1 %53 }
  0x83   :  { %v69_v33 = vpop.permute.xlu0 %68 }
  0x84   :  { %v59_v37 = vpop.permute.xlu1 %58 }
  0x87   :  { %v226_v47 = vpop.permute.xlu0 %225 }
  0x88   :  { %v231_v48 = vpop.permute.xlu1 %230 }
  0x8b   :  { %v216_v52 = vpop.permute.xlu0 %215 }
  0x8c   :  { %v221_v55 = vpop.permute.xlu1 %220 }
  0x8f   :  { %v307_v0 = vpop.permute.xlu0 %306 }
 0x102   :  { %v409_v31 = vpop.f32.mrf.mxu0 }
 0x103   :  { %v195_v35 = vadd.f32 %v409_v31, %v64_v29 }
 0x104   :  { %v186_v32 = vpop.f32.mrf.mxu0 }
 0x105   :  { %v187_v39 = vadd.f32 %v186_v32, %v54_v30 }
 0x106   :  { %v410_v34 = vpop.f32.mrf.mxu0 }
 0x107   :  { %v198_v36 = vadd.f32 %v410_v34, %v69_v33 }
 0x108   :  { %v189_v38 = vpop.f32.mrf.mxu0 }
 0x109   :  { %v202_v40 = vpack.c.bf16 %v198_v36, %v195_v35  ;;  %v190_v41 = vadd.f32 %v189_v38, %v59_v37 }
 0x10b   :  { %452 = vtanh.bf16 %v202_v40  ;;  %v201_v42 = vpack.c.bf16 %v190_v41, %v187_v39 }
 0x10d   :  { %454 = vtanh.bf16 %v201_v42 }
 0x119   :  { %v453_v43 = vpop.eup %452 }
 0x11a   :  { %411 = vmatprep.subr.bf16.mxu1 %v453_v43 }
 0x11b   :  { %v455_v44 = vpop.eup %454  ;;  %412 = vmatpush3.bf16.msra.mxu1 %v453_v43 }
 0x11c   :  { %413 = vmatprep.subr.bf16.mxu1 %v455_v44 }
 0x11f   :  { %414 = vmatpush3.bf16.msra.mxu1 %v455_v44 }
 0x120   :  { %419 = vmatprep.subr.bf16.mxu1 %v461_v46 }
 0x122   :  { %416 = vmatmul.mubr.msk.bf16.vlgmr.msra.gmra.mxu1 %vm121_vm0, %v451_v45 }
 0x123   :  { %423 = vmatprep.mubr.msk.bf16.mxu1 %vm462_vm1, %v461_v46 }
 0x1e2   :  { %v417_v49 = vpop.f32.mrf.mxu1 }
 0x1e3   :  { %v292_v53 = vadd.f32 %v417_v49, %v226_v47 }
 0x1e4   :  { %v283_v50 = vpop.f32.mrf.mxu1 }
 0x1e5   :  { %v284_v57 = vadd.f32 %v283_v50, %v216_v52 }
 0x1e6   :  { %v418_v51 = vpop.f32.mrf.mxu1 }
 0x1e7   :  { %v295_v54 = vadd.f32 %v418_v51, %v231_v48 }
 0x1e8   :  { %v286_v56 = vpop.f32.mrf.mxu1 }
 0x1e9   :  { %v299_v58 = vpack.c.bf16 %v295_v54, %v292_v53  ;;  %v287_v59 = vadd.f32 %v286_v56, %v221_v55 }
 0x1eb   :  { %456 = vtanh.bf16 %v299_v58  ;;  %v298_v60 = vpack.c.bf16 %v287_v59, %v284_v57 }
 0x1ed   :  { %458 = vtanh.bf16 %v298_v60 }
 0x1f9   :  { %v457_v61 = vpop.eup %456 }
 0x1fa   :  { %420 = vmatpush3.bf16.msra.mxu1 %v457_v61 }
 0x1fb   :  { %421 = vmatprep.subr.bf16.mxu1 %v461_v46  ;;  %v459_v62 = vpop.eup %458 }
 0x1fe   :  { %422 = vmatpush3.bf16.msra.mxu1 %v459_v62 }
 0x201   :  { %424 = vmatmul.mubr.msk.bf16.vlgmr.msra.gmra.mxu1 %vm121_vm0, %v302_v63 }
 0x2c1   :  { %v346_v1 = vpop.f32.mrf.mxu1 }
 0x2c2   :  { %v347_v2 = vadd.f32 %v346_v1, %v307_v0 }
 0x2c3   :  { %v425_v3 = vpop.f32.mrf.mxu1 }
 0x2c4   :  { %352 = vst [vmem:[%s600_s7] sm:$0xff] %v347_v2 }
 0x2c5   :  { %v349_v4 = vpop.f32.mrf.mxu1 }
 0x2c7   :  { %v426_v5 = vpop.f32.mrf.mxu1 }

</bundles_post_ra>
